<compile_context>
chip_gen: v5e
topology: v5e:2x2
jax: 0.10.0
libtpu: 0.0.40
codegen_flags: <defaults>
</compile_context>

<pallas_src>
import functools

import jax
import jax.numpy as jnp
from jax import lax
from jax.experimental import pallas as pl
from jax.experimental.pallas import tpu as pltpu


# ---------------------------------------------------------------------------
# helpers
# ---------------------------------------------------------------------------
def _round_up(x, m):
    return ((x + m - 1) // m) * m


def _largest_tile(total, requested, quantum=128):
    """Largest multiple of `quantum` <= requested that divides `total`."""
    assert total % quantum == 0, (total, quantum)
    t = max(quantum, min(requested, total))
    t = (t // quantum) * quantum
    while total % t:
        t -= quantum
    return t


def _vmem_budget_bytes():
    # ~80% of physical VMEM (v5e/v6e: 128 MiB, v7x: 64 MiB); safe fallback.
    try:
        cap = pltpu.get_tpu_info().vmem_capacity_bytes
    except Exception:
        cap = 60 << 20
    return int(cap * 0.8)


# ---------------------------------------------------------------------------
# encode(): seq_logits = (h @ (W * H^-0.25)) ; masked max over seq ; log1p(relu)
#   - padded positions are pre-zeroed in the wrapper (equivalent to the -1e6
#     additive mask because relu follows the max)
# ---------------------------------------------------------------------------
def _encode_kernel(h_ref, w_ref, o_ref, *, tb, seq_len):
    # h_ref: (tb*L, H) bf16 (padded rows pre-zeroed)
    # w_ref: (H, tv) bf16 (pre-scaled by hidden_size**-0.25)
    # o_ref: (tb, tv)  f32
    tv = w_ref.shape[1]
    s = jnp.dot(h_ref[...], w_ref[...],
                preferred_element_type=jnp.float32)          # (tb*L, tv)
    m = jnp.max(s.reshape(tb, seq_len, tv), axis=1)           # (tb, tv)
    o_ref[...] = jnp.log(jnp.maximum(m, 0.0) + 1.0)


def encode(hidden, attention_mask, w_scaled_bf16, *, tv=2048, tb=None):
    """Pallas version of DecoderOnlyBiSparse.encode (LM-head projection + pool)."""
    B, L, H = hidden.shape
    V = w_scaled_bf16.shape[1]
    assert w_scaled_bf16.shape[0] == H

    # Mask + bf16 cast once in the wrapper (fused XLA elementwise pass).
    mask = attention_mask.astype(hidden.dtype)[:, :, None]
    h_bf16 = (hidden * mask).astype(jnp.bfloat16)

    # Batch tile: keep the MXU M-dim (tb*L) healthy.  tb must be a multiple of
    # 8 (or equal to the full padded batch) so the (tb, tv) output block tiles.
    if tb is None:
        if B <= 8:
            tb = B
        else:
            tb = min(_round_up(pl.cdiv(512, L), 8), _round_up(B, 8))
    B_pad = _round_up(B, tb)
    if B_pad != B:
        h_bf16 = jnp.pad(h_bf16, ((0, B_pad - B), (0, 0), (0, 0)))
    h2d = h_bf16.reshape(B_pad * L, H)

    budget = _vmem_budget_bytes()
    tv = _largest_tile(V, tv)

    def vmem_est(tv_):
        return (2 * H * tv_ * 2           # W tile (bf16), double-buffered
                + 2 * tb * L * H * 2      # hidden block (bf16), double-buffered
                + 2 * tb * tv_ * 4        # output block (f32), double-buffered
                + 2 * tb * L * tv_ * 4    # matmul intermediate (f32) + headroom
                + (4 << 20))

    while vmem_est(tv) > budget and tv > 128:
        tv = _largest_tile(V, tv - 128)
    vmem_limit = int(min(max(vmem_est(tv), 16 << 20), budget))

    n_bblk = B_pad // tb
    cost = pl.CostEstimate(
        flops=2 * B_pad * L * H * V,
        transcendentals=B_pad * V,
        # hidden streamed once; bf16 W streamed once per batch block; f32 out.
        bytes_accessed=B_pad * L * H * 2 + n_bblk * H * V * 2 + B_pad * V * 4,
    )

    kernel = functools.partial(_encode_kernel, tb=tb, seq_len=L)

    out = pl.pallas_call(
        kernel,
        out_shape=jax.ShapeDtypeStruct((B_pad, V), jnp.float32),
        grid_spec=pltpu.PrefetchScalarGridSpec(
            num_scalar_prefetch=0,
            # Batch OUTER, vocab INNER: the hidden block stays VMEM-resident
            # across the inner vocab loop; only W tiles stream.
            grid=(n_bblk, V // tv),
            in_specs=[
                pl.BlockSpec((tb * L, H), lambda b, j: (b, 0)),
                pl.BlockSpec((H, tv), lambda b, j: (0, j)),
            ],
            out_specs=pl.BlockSpec((tb, tv), lambda b, j: (b, j)),
        ),
        compiler_params=pltpu.CompilerParams(
            dimension_semantics=("parallel", "parallel"),
            vmem_limit_bytes=vmem_limit),
        cost_estimate=cost,
    )(h2d, w_scaled_bf16)
    return out[:B] if B_pad != B else out


# ---------------------------------------------------------------------------
# MarginMSE rank loss + SPLADE FLOPS regularizers, tiled (streamed) over V.
# ---------------------------------------------------------------------------
def _margin_mse_kernel(q_ref, pos_ref, neg_ref, tpos_ref, tneg_ref,
                       rank_ref, qreg_ref, dreg_ref,
                       margin_acc, reg_acc, *, n_query):
    j = pl.program_id(0)

    @pl.when(j == 0)
    def _():
        margin_acc[...] = jnp.zeros_like(margin_acc)
        reg_acc[...] = jnp.zeros_like(reg_acc)

    q = q_ref[...]          # (Nq, tvl)
    p = pos_ref[...]        # (Nq, tvl)
    n = neg_ref[...]        # (Nq, tvl)

    # Partial student margins over this vocab tile: sum_v q*(pos - neg).
    margin_acc[...] += jnp.sum(q * (p - n), axis=-1, keepdims=True)   # (Nq, 1)

    # FLOPS regularizer partials: sum_v (mean_i |x_iv|)^2 decomposes over V.
    inv_nq = 1.0 / n_query

    def flops_partial(x):
        col = jnp.sum(jnp.abs(x), axis=0, keepdims=True) * inv_nq     # (1, tvl)
        return jnp.sum(col * col)                                      # scalar

    lane = lax.broadcasted_iota(jnp.int32, reg_acc.shape, 1)           # (1, 128)
    upd = jnp.where(lane == 0, flops_partial(q),
          jnp.where(lane == 1, flops_partial(p),
          jnp.where(lane == 2, flops_partial(n), 0.0)))
    reg_acc[...] += upd

    @pl.when(j == pl.num_programs(0) - 1)
    def _():
        teacher = tpos_ref[...] - tneg_ref[...]                        # (Nq, 1)
        diff = margin_acc[...] - teacher
        # torch.nn.MSELoss() default 'mean' reduction over the Nq margins.
        rank_ref[...] = (jnp.sum(diff * diff) * inv_nq).reshape(1, 1)
        racc = reg_acc[...]
        qreg_ref[...] = jnp.sum(jnp.where(lane == 0, racc, 0.0)).reshape(1, 1)
        dreg_ref[...] = (jnp.sum(jnp.where((lane == 1) | (lane == 2),
                                           racc, 0.0)) * 0.5).reshape(1, 1)


def margin_mse_and_reg_losses(q_rep, pos_rep, neg_rep,
                              teacher_pos, teacher_neg, *, tvl=8192):
    Nq, V = q_rep.shape
    budget = _vmem_budget_bytes()
    tvl = _largest_tile(V, tvl)
    while (3 * 2 * Nq * tvl * 4 + (4 << 20)) > budget and tvl > 128:
        tvl = _largest_tile(V, tvl - 128)
    vmem_limit = int(min(max(3 * 2 * Nq * tvl * 4 + (8 << 20), 16 << 20), budget))

    tpos = teacher_pos.astype(jnp.float32).reshape(Nq, 1)
    tneg = teacher_neg.astype(jnp.float32).reshape(Nq, 1)
    kernel = functools.partial(_margin_mse_kernel, n_query=Nq)

    rank, qreg, dreg = pl.pallas_call(
        kernel,
        out_shape=(
            jax.ShapeDtypeStruct((1, 1), jnp.float32),
            jax.ShapeDtypeStruct((1, 1), jnp.float32),
            jax.ShapeDtypeStruct((1, 1), jnp.float32),
        ),
        grid_spec=pltpu.PrefetchScalarGridSpec(
            num_scalar_prefetch=0,
            grid=(V // tvl,),
            in_specs=[
                pl.BlockSpec((Nq, tvl), lambda j: (0, j)),
                pl.BlockSpec((Nq, tvl), lambda j: (0, j)),
                pl.BlockSpec((Nq, tvl), lambda j: (0, j)),
                pl.BlockSpec((Nq, 1), lambda j: (0, 0)),
                pl.BlockSpec((Nq, 1), lambda j: (0, 0)),
            ],
            out_specs=(
                pl.BlockSpec((1, 1), lambda j: (0, 0)),
                pl.BlockSpec((1, 1), lambda j: (0, 0)),
                pl.BlockSpec((1, 1), lambda j: (0, 0)),
            ),
            scratch_shapes=[
                pltpu.VMEM((Nq, 1), jnp.float32),    # student margin accumulator
                pltpu.VMEM((1, 128), jnp.float32),   # FLOPS partials (lanes 0..2)
            ],
        ),
        compiler_params=pltpu.CompilerParams(
            dimension_semantics=("arbitrary",),
            vmem_limit_bytes=vmem_limit),
    )(q_rep, pos_rep, neg_rep, tpos, tneg)
    return rank[0, 0], qreg[0, 0], dreg[0, 0]


# ---------------------------------------------------------------------------
# Full LlamaBiSparseForMarginMSE.forward
# ---------------------------------------------------------------------------
def llama_bi_sparse_margin_mse_forward(params, inputs, *, tv=2048, tvl=8192):
    w = params["lm_head"]
    H = w.shape[0]
    # Fold the hidden_size**-0.25 logit scale into the one-time bf16 weight
    # cast (fuses into the cast XLA already does; halves W's HBM traffic).
    w_bf16 = (w * (float(H) ** -0.25)).astype(jnp.bfloat16)
    q_rep = encode(inputs["q_hidden"], inputs["q_mask"], w_bf16, tv=tv)
    pos_rep = encode(inputs["pos_hidden"], inputs["pos_mask"], w_bf16, tv=tv)
    neg_rep = encode(inputs["neg_hidden"], inputs["neg_mask"], w_bf16, tv=tv)
    rank, qreg, dreg = margin_mse_and_reg_losses(
        q_rep, pos_rep, neg_rep,
        inputs["teacher_pos_scores"], inputs["teacher_neg_scores"], tvl=tvl)
    return {"rank": rank, "query_reg": qreg, "doc_reg": dreg}


# ---------------------------------------------------------------------------
# Pure-JAX reference (matches the PyTorch module semantics)
# ---------------------------------------------------------------------------
def _ref_encode(h, mask, w):
    B, L, H = h.shape
    s = jnp.dot(h.astype(jnp.bfloat16).reshape(B * L, H),
                w.astype(jnp.bfloat16),
                preferred_element_type=jnp.float32)
    s = s.reshape(B, L, -1) * (float(H) ** -0.25)
    s = s + (1.0 - mask)[:, :, None] * -1e6
    return jnp.log(jnp.maximum(jnp.max(s, axis=1), 0.0) + 1.0)


def _ref_forward(params, inputs):
    w = params["lm_head"]
    q = _ref_encode(inputs["q_hidden"], inputs["q_mask"], w)
    p = _ref_encode(inputs["pos_hidden"], inputs["pos_mask"], w)
    n = _ref_encode(inputs["neg_hidden"], inputs["neg_mask"], w)
    student = jnp.sum(q * p, axis=-1) - jnp.sum(q * n, axis=-1)
    teacher = inputs["teacher_pos_scores"] - inputs["teacher_neg_scores"]
    rank = jnp.mean((student - teacher) ** 2)
    flops = lambda x: jnp.sum(jnp.mean(jnp.abs(x), axis=0) ** 2)
    return {"rank": rank, "query_reg": flops(q),
            "doc_reg": (flops(p) + flops(n)) / 2.0}


if __name__ == "__main__":
    Nq, L, H, V = 4, 8, 128, 1024

    key = jax.random.PRNGKey(0)
    k1, k2, k3, k4, k5, k6 = jax.random.split(key, 6)

    # Synthetic last-hidden-states standing in for the Llama backbone output.
    q_hidden = jax.random.normal(k1, (Nq, L, H), jnp.float32)
    pos_hidden = jax.random.normal(k2, (Nq, L, H), jnp.float32)
    neg_hidden = jax.random.normal(k3, (Nq, L, H), jnp.float32)
    # Deterministic LM-head weight (hidden -> vocab).
    lm_head = jax.random.normal(k4, (H, V), jnp.float32) * (H ** -0.5)
    teacher_pos = jax.random.normal(k5, (Nq,), jnp.float32)
    teacher_neg = jax.random.normal(k6, (Nq,), jnp.float32)

    # Attention masks with some padding.
    q_lens = jnp.array([8, 5, 7, 6], jnp.int32)
    p_lens = jnp.array([8, 6, 7, 5], jnp.int32)
    n_lens = jnp.array([4, 8, 6, 7], jnp.int32)
    q_mask = (jnp.arange(L)[None, :] < q_lens[:, None]).astype(jnp.float32)
    p_mask = (jnp.arange(L)[None, :] < p_lens[:, None]).astype(jnp.float32)
    n_mask = (jnp.arange(L)[None, :] < n_lens[:, None]).astype(jnp.float32)

    params = {"lm_head": lm_head}
    inputs = {
        "q_hidden": q_hidden, "q_mask": q_mask,
        "pos_hidden": pos_hidden, "pos_mask": p_mask,
        "neg_hidden": neg_hidden, "neg_mask": n_mask,
        "teacher_pos_scores": teacher_pos,
        "teacher_neg_scores": teacher_neg,
    }

    out = llama_bi_sparse_margin_mse_forward(params, inputs, tv=2048, tvl=8192)
    out = jax.block_until_ready(out)

    ref = _ref_forward(params, inputs)
    for name in ("rank", "query_reg", "doc_reg"):
        assert jnp.allclose(out[name], ref[name], rtol=2e-2, atol=2e-3), (
            name, out[name], ref[name])

    print("KERNEL_OK")
</pallas_src>

<mosaic_0001>
module attributes {stable_mosaic.version = 11 : i64} {
  func.func @_encode_kernel(%arg0: i32, %arg1: i32, %arg2: memref<32x128xbf16, #tpu.memory_space<vmem>>, %arg3: memref<128x1024xbf16, #tpu.memory_space<vmem>>, %arg4: memref<4x1024xf32, #tpu.memory_space<vmem>>) attributes {dimension_semantics = [#tpu.dimension_semantics<parallel>, #tpu.dimension_semantics<parallel>], iteration_bounds = array<i64: 1, 1>, scalar_prefetch = 0 : i64, scratch_operands = 0 : i64, tpu.core_type = #tpu.core_type<tc>, window_params = [{transform_indices = @transform_0, window_bounds = array<i64: 32, 128>}, {transform_indices = @transform_1, window_bounds = array<i64: 128, 1024>}, {transform_indices = @transform_2, window_bounds = array<i64: 4, 1024>}]} {
    %c0 = arith.constant 0 : index
    %c0_0 = arith.constant 0 : index
    %0 = vector.load %arg2[%c0, %c0_0] : memref<32x128xbf16, #tpu.memory_space<vmem>>, vector<32x128xbf16>
    %c0_1 = arith.constant 0 : index
    %c0_2 = arith.constant 0 : index
    %1 = vector.load %arg3[%c0_1, %c0_2] : memref<128x1024xbf16, #tpu.memory_space<vmem>>, vector<128x1024xbf16>
    %cst = arith.constant dense<0.000000e+00> : vector<32x1024xf32>
    %2 = tpu.matmul %0, %1, %cst {dimension_numbers = #tpu.dot_dimension_numbers<[1], [0], [0], [1], [0, 0, 1, 1], [], []>} : vector<32x128xbf16>, vector<128x1024xbf16>, vector<32x1024xf32> -> vector<32x1024xf32>
    %3 = vector.shape_cast %2 : vector<32x1024xf32> to vector<4x8x1024xf32>
    %cst_3 = arith.constant dense<0xFF800000> : vector<4x1024xf32>
    %4 = vector.multi_reduction <maximumf>, %3, %cst_3 [1] : vector<4x8x1024xf32> to vector<4x1024xf32>
    %cst_4 = arith.constant 0.000000e+00 : f32
    %5 = vector.broadcast %cst_4 : f32 to vector<4x1024xf32>
    %6 = arith.maximumf %4, %5 : vector<4x1024xf32>
    %cst_5 = arith.constant 1.000000e+00 : f32
    %7 = vector.broadcast %cst_5 : f32 to vector<4x1024xf32>
    %8 = arith.addf %6, %7 : vector<4x1024xf32>
    %9 = math.log %8 : vector<4x1024xf32>
    %c0_6 = arith.constant 0 : index
    %c0_7 = arith.constant 0 : index
    %10 = vector.load %arg4[%c0_6, %c0_7] : memref<4x1024xf32, #tpu.memory_space<vmem>>, vector<4x1024xf32>
    tpu.vector_store %arg4[%c0_6, %c0_7], %9 {strides = array<i32>} : memref<4x1024xf32, #tpu.memory_space<vmem>>, vector<4x1024xf32>,
    return
  }
  func.func @transform_0(%arg0: i32, %arg1: i32) -> (i32, i32) {
    %c0_i32 = arith.constant 0 : i32
    %c0_i32_0 = arith.constant 0 : i32
    return %arg0, %c0_i32 : i32, i32
  }
  func.func @transform_1(%arg0: i32, %arg1: i32) -> (i32, i32) {
    %c0_i32 = arith.constant 0 : i32
    %c0_i32_0 = arith.constant 0 : i32
    return %c0_i32, %arg1 : i32, i32
  }
  func.func @transform_2(%arg0: i32, %arg1: i32) -> (i32, i32) {
    %c0_i32 = arith.constant 0 : i32
    return %arg0, %arg1 : i32, i32
  }
}

</mosaic_0001>

<bundles_post_ra>
// kernel: tpu_custom_call.1
= control target key start
LH: loop header
LB: loop body
LE: loop exit
PB: predicated region body
PF: predicated region fallthrough
CT: control target
= control target key end

     0   :  { %7 = vsyncpa [#allocation3], 0  ;;  %s1662_s0 = inlined_call_operand.hbm [shape: bf16[32,128], index: 0, kind: input, shape index: {}]   ;;  %s1663_s1 = inlined_call_operand.hbm [shape: bf16[128,1024], index: 1, kind: input, shape index: {}]   ;;  %s1664_s2 = inlined_call_operand.hbm [shape: f32[4,1024], index: 2, kind: output, shape index: {}]  }
   0x1   :  { %8 = vsyncpa [#allocation6], 0 }
   0x2   :  { %9 = vsyncpa [#allocation4], 0  ;;  %s14_s11 = sshll.u32 %s1662_s0, 4  ;;  %s1528_s12 = smov [#allocation2]   ;;  %s15_s11 = int_to_ptr.hbm [resolvable:$true] %s14_s11 }
   0x3   :  { %s16_s13 = sshll.u32 %s1528_s12, 4  ;;  %s27_s16 = sshll.u32 %s1663_s1, 4  ;;  %s17_s13 = int_to_ptr.vmem [resolvable:$true] %s16_s13  ;;  %s28_s16 = int_to_ptr.hbm [resolvable:$true] %s27_s16 }
   0x4   :  { %s1529_s17 = smov 64   ;;  %s1530_s18 = smov 4  }
   0x5   :  { %22 = dma.hbm_to_vmem [thread:$0]  %s15_s11, 256, %s17_s13, [#allocation3], %s1529_s17, %s1529_s17, %s1530_s18  }
   0x6   :  { %s1531_s19 = smov [#allocation5]   ;;  %s1532_s21 = smov 512  }
   0x7   :  { %s29_s20 = sshll.u32 %s1531_s19, 4  ;;  %s1533_s22 = smov 32   ;;  %s30_s20 = int_to_ptr.vmem [resolvable:$true] %s29_s20 }
   0x8   :  { %35 = dma.hbm_to_vmem [thread:$0]  %s28_s16, 8192, %s30_s20, [#allocation6], %s1532_s21, %s1532_s21, %s1533_s22  }
   0x9   :  { %1522 = dma.done.wait [#allocation3], 256  }
   0xa   :  { %1523 = vsyncadd [#allocation3], 4294967040 }
   0xb   :  { %1524 = dma.done.wait [#allocation6], 8192  }
   0xc   :  { %1525 = vsyncadd [#allocation6], 4294959104  ;;  %v1283_v0 = vld [vmem:[#allocation5 + $0x1c0] sm:$0xf]  ;;  %v1371_v2 = vld [vmem:[#allocation5 + $0x1c4] sm:$0xf] }
   0xd   :  { %v1375_v1 = vld [vmem:[#allocation5 + $0x1dc] sm:$0xf0]  ;;  %v1285_v4 = vld [vmem:[#allocation5 + $0x1e0] sm:$0xf0]  ;;  %v1291_v5 = vld [vmem:[#allocation5 + $0x1c8] sm:$0xf] }
   0xe   :  { %v1284_v3 = vor.u32 %v1375_v1, %v1283_v0  ;;  %v1376_v6 = vld [vmem:[#allocation5 + $0x1e4] sm:$0xf0]  ;;  %v1288_v7 = vor.u32 %v1371_v2, %v1285_v4  ;;  %v1372_v9 = vld [vmem:[#allocation5 + $0x1cc] sm:$0xf]  ;;  %v1251_v11 = vld [vmem:[#allocation5 + $0x180] sm:$0xf] }
   0xf   :  { %v1292_v8 = vor.u32 %v1376_v6, %v1291_v5  ;;  %v1293_v10 = vld [vmem:[#allocation5 + $0x1e8] sm:$0xf0]  ;;  %v1367_v13 = vld [vmem:[#allocation5 + $0x19c] sm:$0xf0]  ;;  %v1363_v14 = vld [vmem:[#allocation5 + $0x184] sm:$0xf] }
  0x10   :  { %444 = vmatpush.bf16.msra.mxu0 %v1284_v3  ;;  %v1296_v12 = vor.u32 %v1372_v9, %v1293_v10  ;;  %v1253_v15 = vld [vmem:[#allocation5 + $0x1a0] sm:$0xf0]  ;;  %463 = vmatpush.bf16.msra.mxu1 %v1288_v7  ;;  %v1252_v16 = vor.u32 %v1367_v13, %v1251_v11  ;;  %v1259_v18 = vld [vmem:[#allocation5 + $0x188] sm:$0xf]  ;;  %v1364_v20 = vld [vmem:[#allocation5 + $0x18c] sm:$0xf] }
  0x11   :  { %482 = vmatpush.bf16.msra.mxu2 %v1292_v8  ;;  %v1256_v17 = vor.u32 %v1363_v14, %v1253_v15  ;;  %v1368_v19 = vld [vmem:[#allocation5 + $0x1a4] sm:$0xf0]  ;;  %v1261_v22 = vld [vmem:[#allocation5 + $0x1a8] sm:$0xf0]  ;;  %v1219_v23 = vld [vmem:[#allocation5 + $0x140] sm:$0xf] }
  0x12   :  { %501 = vmatpush.bf16.msra.mxu3 %v1296_v12  ;;  %v1260_v21 = vor.u32 %v1368_v19, %v1259_v18  ;;  %v1359_v24 = vld [vmem:[#allocation5 + $0x15c] sm:$0xf0]  ;;  %v1264_v25 = vor.u32 %v1364_v20, %v1261_v22  ;;  %v1355_v26 = vld [vmem:[#allocation5 + $0x144] sm:$0xf]  ;;  %v1227_v28 = vld [vmem:[#allocation5 + $0x148] sm:$0xf] }
  0x13   :  { %v1221_v27 = vld [vmem:[#allocation5 + $0x160] sm:$0xf0]  ;;  %v1220_v29 = vor.u32 %v1359_v24, %v1219_v23  ;;  %v1360_v30 = vld [vmem:[#allocation5 + $0x164] sm:$0xf0]  ;;  %v1356_v31 = vld [vmem:[#allocation5 + $0x14c] sm:$0xf] }
  0x14   :  { %445 = vmatpush.bf16.msra.mxu0 %v1252_v16  ;;  %v1229_v32 = vld [vmem:[#allocation5 + $0x168] sm:$0xf0]  ;;  %464 = vmatpush.bf16.msra.mxu1 %v1256_v17  ;;  %v1224_v33 = vor.u32 %v1355_v26, %v1221_v27  ;;  %v1228_v34 = vor.u32 %v1360_v30, %v1227_v28  ;;  %v1187_v35 = vld [vmem:[#allocation5 + $0x100] sm:$0xf]  ;;  %v1347_v37 = vld [vmem:[#allocation5 + $0x104] sm:$0xf] }
  0x15   :  { %483 = vmatpush.bf16.msra.mxu2 %v1260_v21  ;;  %v1351_v36 = vld [vmem:[#allocation5 + $0x11c] sm:$0xf0]  ;;  %v1232_v38 = vor.u32 %v1356_v31, %v1229_v32  ;;  %v1189_v39 = vld [vmem:[#allocation5 + $0x120] sm:$0xf0]  ;;  %v1195_v40 = vld [vmem:[#allocation5 + $0x108] sm:$0xf] }
  0x16   :  { %502 = vmatpush.bf16.msra.mxu3 %v1264_v25  ;;  %v1352_v41 = vld [vmem:[#allocation5 + $0x124] sm:$0xf0]  ;;  %v1348_v42 = vld [vmem:[#allocation5 + $0x10c] sm:$0xf]  ;;  %v1188_v44 = vor.u32 %v1351_v36, %v1187_v35  ;;  %v1192_v45 = vor.u32 %v1347_v37, %v1189_v39  ;;  %v1155_v47 = vld [vmem:[#allocation5 + $0xc0] sm:$0xf] }
  0x17   :  { %v1197_v43 = vld [vmem:[#allocation5 + $0x128] sm:$0xf0]  ;;  %v1196_v46 = vor.u32 %v1352_v41, %v1195_v40  ;;  %v1343_v48 = vld [vmem:[#allocation5 + $0xdc] sm:$0xf0]  ;;  %v1339_v49 = vld [vmem:[#allocation5 + $0xc4] sm:$0xf] }
  0x18   :  { %446 = vmatpush.bf16.msra.mxu0 %v1220_v29  ;;  %465 = vmatpush.bf16.msra.mxu1 %v1224_v33  ;;  %v1200_v50 = vor.u32 %v1348_v42, %v1197_v43  ;;  %v1157_v51 = vld [vmem:[#allocation5 + $0xe0] sm:$0xf0]  ;;  %v1163_v52 = vld [vmem:[#allocation5 + $0xc8] sm:$0xf]  ;;  %v1340_v54 = vld [vmem:[#allocation5 + $0xcc] sm:$0xf]  ;;  %v1156_v56 = vor.u32 %v1343_v48, %v1155_v47 }
  0x19   :  { %484 = vmatpush.bf16.msra.mxu2 %v1228_v34  ;;  %v1344_v53 = vld [vmem:[#allocation5 + $0xe4] sm:$0xf0]  ;;  %v1165_v55 = vld [vmem:[#allocation5 + $0xe8] sm:$0xf0]  ;;  %v1160_v57 = vor.u32 %v1339_v49, %v1157_v51  ;;  %v1123_v59 = vld [vmem:[#allocation5 + $0x80] sm:$0xf] }
  0x1a   :  { %503 = vmatpush.bf16.msra.mxu3 %v1232_v38  ;;  %v1164_v58 = vor.u32 %v1344_v53, %v1163_v52  ;;  %v1335_v60 = vld [vmem:[#allocation5 + $0x9c] sm:$0xf0]  ;;  %v1331_v61 = vld [vmem:[#allocation5 + $0x84] sm:$0xf]  ;;  %v1168_v62 = vor.u32 %v1340_v54, %v1165_v55  ;;  %v1131_v0 = vld [vmem:[#allocation5 + $0x88] sm:$0xf] }
  0x1b   :  { %v1125_v63 = vld [vmem:[#allocation5 + $0xa0] sm:$0xf0]  ;;  %v1336_v1 = vld [vmem:[#allocation5 + $0xa4] sm:$0xf0]  ;;  %v1332_v2 = vld [vmem:[#allocation5 + $0x8c] sm:$0xf]  ;;  %v1124_v4 = vor.u32 %v1335_v60, %v1123_v59 }
  0x1c   :  { %447 = vmatpush.bf16.msra.mxu0 %v1188_v44  ;;  %466 = vmatpush.bf16.msra.mxu1 %v1192_v45  ;;  %v1133_v3 = vld [vmem:[#allocation5 + $0xa8] sm:$0xf0]  ;;  %v1128_v5 = vor.u32 %v1331_v61, %v1125_v63  ;;  %v1132_v6 = vor.u32 %v1336_v1, %v1131_v0  ;;  %v1091_v7 = vld [vmem:[#allocation5 + $0x40] sm:$0xf]  ;;  %v1323_v9 = vld [vmem:[#allocation5 + $0x44] sm:$0xf] }
  0x1d   :  { %485 = vmatpush.bf16.msra.mxu2 %v1196_v46  ;;  %v1327_v8 = vld [vmem:[#allocation5 + $0x5c] sm:$0xf0]  ;;  %v1136_v10 = vor.u32 %v1332_v2, %v1133_v3  ;;  %v1093_v11 = vld [vmem:[#allocation5 + $0x60] sm:$0xf0]  ;;  %v1099_v12 = vld [vmem:[#allocation5 + $0x48] sm:$0xf] }
  0x1e   :  { %504 = vmatpush.bf16.msra.mxu3 %v1200_v50  ;;  %v1328_v13 = vld [vmem:[#allocation5 + $0x64] sm:$0xf0]  ;;  %v1324_v14 = vld [vmem:[#allocation5 + $0x4c] sm:$0xf]  ;;  %v1092_v16 = vor.u32 %v1327_v8, %v1091_v7  ;;  %v1059_v17 = vld [vmem:[#allocation5] sm:$0xf]  ;;  %v1096_v18 = vor.u32 %v1323_v9, %v1093_v11 }
  0x1f   :  { %v1101_v15 = vld [vmem:[#allocation5 + $0x68] sm:$0xf0]  ;;  %v1100_v19 = vor.u32 %v1328_v13, %v1099_v12  ;;  %v1319_v20 = vld [vmem:[#allocation5 + $0x1c] sm:$0xf0]  ;;  %v1315_v21 = vld [vmem:[#allocation5 + $0x4] sm:$0xf] }
  0x20   :  { %448 = vmatpush.bf16.msra.mxu0 %v1156_v56  ;;  %467 = vmatpush.bf16.msra.mxu1 %v1160_v57  ;;  %v1061_v22 = vld [vmem:[#allocation5 + $0x20] sm:$0xf0]  ;;  %v1104_v23 = vor.u32 %v1324_v14, %v1101_v15  ;;  %v1067_v24 = vld [vmem:[#allocation5 + $0x8] sm:$0xf]  ;;  %v1316_v26 = vld [vmem:[#allocation5 + $0xc] sm:$0xf]  ;;  %v1060_v30 = vor.u32 %v1319_v20, %v1059_v17 }
  0x21   :  { %486 = vmatpush.bf16.msra.mxu2 %v1164_v58  ;;  %v1320_v25 = vld [vmem:[#allocation5 + $0x24] sm:$0xf0]  ;;  %v1069_v27 = vld [vmem:[#allocation5 + $0x28] sm:$0xf0]  ;;  %v1299_v28 = vld [vmem:[#allocation5 + $0x1d0] sm:$0xf]  ;;  %v1064_v33 = vor.u32 %v1315_v21, %v1061_v22 }
  0x22   :  { %505 = vmatpush.bf16.msra.mxu3 %v1168_v62  ;;  %v1377_v29 = vld [vmem:[#allocation5 + $0x1ec] sm:$0xf0]  ;;  %v1374_v31 = vld [vmem:[#allocation5 + $0x1dc] sm:$0xf]  ;;  %v1068_v34 = vor.u32 %v1320_v25, %v1067_v24  ;;  %v1072_v36 = vor.u32 %v1316_v26, %v1069_v27  ;;  %v1373_v38 = vld [vmem:[#allocation5 + $0x1d4] sm:$0xf] }
  0x23   :  { %v1309_v32 = vld [vmem:[#allocation5 + $0x1f8] sm:$0xf0]  ;;  %v1556_v35 = vld [vmem:[#allocation2] sm:$0xff]  ;;  %v1300_v37 = vor.u32 %v1377_v29, %v1299_v28  ;;  %v1307_v40 = vld [vmem:[#allocation5 + $0x1d8] sm:$0xf]  ;;  %vm964_vm0 = vcmask 1043456  }
  0x24   :  { %449 = vmatpush.bf16.msra.mxu0 %v1124_v4  ;;  %468 = vmatpush.bf16.msra.mxu1 %v1128_v5  ;;  %v1301_v39 = vld [vmem:[#allocation5 + $0x1f0] sm:$0xf0]  ;;  %v1312_v41 = vor.u32 %v1374_v31, %v1309_v32  ;;  %v1378_v42 = vld [vmem:[#allocation5 + $0x1f4] sm:$0xf0]  ;;  %v1267_v43 = vld [vmem:[#allocation5 + $0x190] sm:$0xf] }
  0x25   :  { %487 = vmatpush.bf16.msra.mxu2 %v1132_v6  ;;  %v1369_v44 = vld [vmem:[#allocation5 + $0x1ac] sm:$0xf0]  ;;  %v1366_v45 = vld [vmem:[#allocation5 + $0x19c] sm:$0xf]  ;;  %v1304_v47 = vor.u32 %v1373_v38, %v1301_v39  ;;  %v1308_v48 = vor.u32 %v1378_v42, %v1307_v40  ;;  %v1365_v50 = vld [vmem:[#allocation5 + $0x194] sm:$0xf] }
  0x26   :  { %506 = vmatpush.bf16.msra.mxu3 %v1136_v10  ;;  %v1277_v46 = vld [vmem:[#allocation5 + $0x1b8] sm:$0xf0]  ;;  %v1268_v49 = vor.u32 %v1369_v44, %v1267_v43  ;;  %v1269_v51 = vld [vmem:[#allocation5 + $0x1b0] sm:$0xf0]  ;;  %v1275_v52 = vld [vmem:[#allocation5 + $0x198] sm:$0xf] }
  0x27   :  { %v1280_v53 = vor.u32 %v1366_v45, %v1277_v46  ;;  %v1370_v54 = vld [vmem:[#allocation5 + $0x1b4] sm:$0xf0]  ;;  %v1235_v55 = vld [vmem:[#allocation5 + $0x150] sm:$0xf]  ;;  %v1358_v57 = vld [vmem:[#allocation5 + $0x15c] sm:$0xf]  ;;  %v1272_v59 = vor.u32 %v1365_v50, %v1269_v51 }
  0x28   :  { %450 = vmatpush.bf16.msra.mxu0 %v1092_v16  ;;  %469 = vmatpush.bf16.msra.mxu1 %v1096_v18  ;;  %v1361_v56 = vld [vmem:[#allocation5 + $0x16c] sm:$0xf0]  ;;  %v1245_v58 = vld [vmem:[#allocation5 + $0x178] sm:$0xf0]  ;;  %v1276_v60 = vor.u32 %v1370_v54, %v1275_v52  ;;  %v1357_v62 = vld [vmem:[#allocation5 + $0x154] sm:$0xf] }
  0x29   :  { %488 = vmatpush.bf16.msra.mxu2 %v1100_v19  ;;  %v1236_v61 = vor.u32 %v1361_v56, %v1235_v55  ;;  %v1237_v63 = vld [vmem:[#allocation5 + $0x170] sm:$0xf0]  ;;  %v1243_v0 = vld [vmem:[#allocation5 + $0x158] sm:$0xf]  ;;  %v1248_v1 = vor.u32 %v1358_v57, %v1245_v58  ;;  %v1203_v3 = vld [vmem:[#allocation5 + $0x110] sm:$0xf] }
  0x2a   :  { %507 = vmatpush.bf16.msra.mxu3 %v1104_v23  ;;  %v1362_v2 = vld [vmem:[#allocation5 + $0x174] sm:$0xf0]  ;;  %v1353_v4 = vld [vmem:[#allocation5 + $0x12c] sm:$0xf0]  ;;  %v1350_v5 = vld [vmem:[#allocation5 + $0x11c] sm:$0xf]  ;;  %v1240_v7 = vor.u32 %v1357_v62, %v1237_v63 }
  0x2b   :  { %v1213_v6 = vld [vmem:[#allocation5 + $0x138] sm:$0xf0]  ;;  %v1244_v8 = vor.u32 %v1362_v2, %v1243_v0  ;;  %v1204_v9 = vor.u32 %v1353_v4, %v1203_v3  ;;  %v1349_v10 = vld [vmem:[#allocation5 + $0x114] sm:$0xf]  ;;  %v1211_v12 = vld [vmem:[#allocation5 + $0x118] sm:$0xf] }
  0x2c   :  { %451 = vmatpush.bf16.msra.mxu0 %v1060_v30  ;;  %470 = vmatpush.bf16.msra.mxu1 %v1064_v33  ;;  %v1205_v11 = vld [vmem:[#allocation5 + $0x130] sm:$0xf0]  ;;  %v1216_v13 = vor.u32 %v1350_v5, %v1213_v6  ;;  %v1354_v14 = vld [vmem:[#allocation5 + $0x134] sm:$0xf0]  ;;  %v1171_v15 = vld [vmem:[#allocation5 + $0xd0] sm:$0xf] }
  0x2d   :  { %489 = vmatpush.bf16.msra.mxu2 %v1068_v34  ;;  %v1345_v16 = vld [vmem:[#allocation5 + $0xec] sm:$0xf0]  ;;  %v1342_v17 = vld [vmem:[#allocation5 + $0xdc] sm:$0xf]  ;;  %v1208_v19 = vor.u32 %v1349_v10, %v1205_v11  ;;  %v1212_v21 = vor.u32 %v1354_v14, %v1211_v12  ;;  %v1341_v23 = vld [vmem:[#allocation5 + $0xd4] sm:$0xf] }
  0x2e   :  { %508 = vmatpush.bf16.msra.mxu3 %v1072_v36  ;;  %v1181_v18 = vld [vmem:[#allocation5 + $0xf8] sm:$0xf0]  ;;  %v1172_v22 = vor.u32 %v1345_v16, %v1171_v15  ;;  %v1173_v24 = vld [vmem:[#allocation5 + $0xf0] sm:$0xf0]  ;;  %v1179_v25 = vld [vmem:[#allocation5 + $0xd8] sm:$0xf] }
  0x2f   :  { %452 = vmatmul.bf16.vlgmr.msra.gmra.mxu0 %v1556_v35  ;;  %471 = vmatmul.bf16.vlgmr.msra.gmra.mxu1 %v1556_v35  ;;  %v1562_v20 = vld [vmem:[#allocation2 + $0x8] sm:$0xff]  ;;  %v1184_v26 = vor.u32 %v1342_v17, %v1181_v18  ;;  %v1139_v28 = vld [vmem:[#allocation5 + $0x90] sm:$0xf]  ;;  %v1176_v32 = vor.u32 %v1341_v23, %v1173_v24  ;;  %v1333_v36 = vld [vmem:[#allocation5 + $0x94] sm:$0xf]  ;;  %vm982_vm1 = vcmask 1041409  }
  0x30   :  { %520 = vmatpush.bf16.msrb.mxu0 %v1300_v37  ;;  %490 = vmatmul.bf16.vlgmr.msra.gmra.mxu2 %v1556_v35  ;;  %v1346_v27 = vld [vmem:[#allocation5 + $0xf4] sm:$0xf0]  ;;  %v1337_v29 = vld [vmem:[#allocation5 + $0xac] sm:$0xf0]  ;;  %v1334_v30 = vld [vmem:[#allocation5 + $0x9c] sm:$0xf] }
  0x31   :  { %509 = vmatmul.bf16.vlgmr.msra.gmra.mxu3 %v1556_v35  ;;  %539 = vmatpush.bf16.msrb.mxu1 %v1304_v47  ;;  %v1149_v31 = vld [vmem:[#allocation5 + $0xb8] sm:$0xf0]  ;;  %v1180_v33 = vor.u32 %v1346_v27, %v1179_v25  ;;  %v1140_v34 = vor.u32 %v1337_v29, %v1139_v28  ;;  %v1141_v37 = vld [vmem:[#allocation5 + $0xb0] sm:$0xf0]  ;;  %v1147_v38 = vld [vmem:[#allocation5 + $0x98] sm:$0xf] }
  0x32   :  { %577 = vmatpush.bf16.msrb.mxu3 %v1312_v41  ;;  %558 = vmatpush.bf16.msrb.mxu2 %v1308_v48  ;;  %v1152_v39 = vor.u32 %v1334_v30, %v1149_v31  ;;  %v1338_v40 = vld [vmem:[#allocation5 + $0xb4] sm:$0xf0]  ;;  %v1107_v41 = vld [vmem:[#allocation5 + $0x50] sm:$0xf]  ;;  %v1326_v43 = vld [vmem:[#allocation5 + $0x5c] sm:$0xf]  ;;  %v1144_v45 = vor.u32 %v1333_v36, %v1141_v37 }
  0x33   :  { %v1329_v42 = vld [vmem:[#allocation5 + $0x6c] sm:$0xf0]  ;;  %v1117_v44 = vld [vmem:[#allocation5 + $0x78] sm:$0xf0]  ;;  %v1148_v46 = vor.u32 %v1338_v40, %v1147_v38  ;;  %v1325_v48 = vld [vmem:[#allocation5 + $0x54] sm:$0xf] }
  0x34   :  { %521 = vmatpush.bf16.msrb.mxu0 %v1268_v49  ;;  %v1108_v47 = vor.u32 %v1329_v42, %v1107_v41  ;;  %v1109_v49 = vld [vmem:[#allocation5 + $0x70] sm:$0xf0]  ;;  %v1115_v50 = vld [vmem:[#allocation5 + $0x58] sm:$0xf]  ;;  %v1120_v51 = vor.u32 %v1326_v43, %v1117_v44  ;;  %v1321_v54 = vld [vmem:[#allocation5 + $0x2c] sm:$0xf0] }
  0x35   :  { %540 = vmatpush.bf16.msrb.mxu1 %v1272_v59  ;;  %v1330_v52 = vld [vmem:[#allocation5 + $0x74] sm:$0xf0]  ;;  %v1318_v55 = vld [vmem:[#allocation5 + $0x1c] sm:$0xf]  ;;  %v1112_v57 = vor.u32 %v1325_v48, %v1109_v49  ;;  %vm984_vm2 = vcmask 1045509   ;;  %vm987_vm3 = vcmask 1042434  }
  0x36   :  { %578 = vmatpush.bf16.msrb.mxu3 %v1280_v53  ;;  %559 = vmatpush.bf16.msrb.mxu2 %v1276_v60  ;;  %v1075_v53 = vld [vmem:[#allocation5 + $0x10] sm:$0xf]  ;;  %v1085_v56 = vld [vmem:[#allocation5 + $0x38] sm:$0xf0]  ;;  %v1116_v58 = vor.u32 %v1330_v52, %v1115_v50  ;;  %v1317_v60 = vld [vmem:[#allocation5 + $0x14] sm:$0xf] }
  0x37   :  { %v1076_v59 = vor.u32 %v1321_v54, %v1075_v53  ;;  %v1088_v62 = vor.u32 %v1318_v55, %v1085_v56  ;;  %v1083_v63 = vld [vmem:[#allocation5 + $0x18] sm:$0xf]  ;;  %vm989_vm4 = vcmask 1046534   ;;  %vm992_vm5 = vcmask 1043459   ;;  %s1534_s0 = smov [#allocation7]   ;;  %s1038_s25 = sshll.u32 %s1664_s2, 4  ;;  %s1039_s25 = int_to_ptr.hbm [resolvable:$true] %s1038_s25 }
  0x38   :  { %522 = vmatpush.bf16.msrb.mxu0 %v1236_v61  ;;  %v1077_v61 = vld [vmem:[#allocation5 + $0x30] sm:$0xf0]  ;;  %v1322_v0 = vld [vmem:[#allocation5 + $0x34] sm:$0xf0]  ;;  %vm994_vm6 = vcmask 1047559   ;;  %s1036_s1 = sshll.u32 %s1534_s0, 4  ;;  %s1037_s1 = int_to_ptr.vmem [resolvable:$true] %s1036_s1 }
  0x39   :  { %541 = vmatpush.bf16.msrb.mxu1 %v1240_v7  ;;  %v1084_v2 = vor.u32 %v1322_v0, %v1083_v63 }
  0x3a   :  { %579 = vmatpush.bf16.msrb.mxu3 %v1248_v1  ;;  %560 = vmatpush.bf16.msrb.mxu2 %v1244_v8  ;;  %v1080_v1 = vor.u32 %v1317_v60, %v1077_v61 }
  0x3c   :  { %523 = vmatpush.bf16.msrb.mxu0 %v1204_v9 }
  0x3d   :  { %542 = vmatpush.bf16.msrb.mxu1 %v1208_v19 }
  0x3e   :  { %580 = vmatpush.bf16.msrb.mxu3 %v1216_v13  ;;  %561 = vmatpush.bf16.msrb.mxu2 %v1212_v21 }
  0x3f   :  { %457 = vmatmul.bf16.gmra.mxu0 %v1562_v20  ;;  %476 = vmatmul.bf16.gmra.mxu1 %v1562_v20 }
  0x40   :  { %524 = vmatpush.bf16.msrb.mxu0 %v1172_v22  ;;  %495 = vmatmul.bf16.gmra.mxu2 %v1562_v20 }
  0x41   :  { %514 = vmatmul.bf16.gmra.mxu3 %v1562_v20  ;;  %543 = vmatpush.bf16.msrb.mxu1 %v1176_v32 }
  0x42   :  { %581 = vmatpush.bf16.msrb.mxu3 %v1184_v26  ;;  %562 = vmatpush.bf16.msrb.mxu2 %v1180_v33 }
  0x44   :  { %525 = vmatpush.bf16.msrb.mxu0 %v1140_v34 }
  0x45   :  { %544 = vmatpush.bf16.msrb.mxu1 %v1144_v45 }
  0x46   :  { %582 = vmatpush.bf16.msrb.mxu3 %v1152_v39  ;;  %563 = vmatpush.bf16.msrb.mxu2 %v1148_v46 }
  0x48   :  { %526 = vmatpush.bf16.msrb.mxu0 %v1108_v47 }
  0x49   :  { %545 = vmatpush.bf16.msrb.mxu1 %v1112_v57 }
  0x4a   :  { %583 = vmatpush.bf16.msrb.mxu3 %v1120_v51  ;;  %564 = vmatpush.bf16.msrb.mxu2 %v1116_v58 }
  0x4c   :  { %527 = vmatpush.bf16.msrb.mxu0 %v1076_v59 }
  0x4d   :  { %546 = vmatpush.bf16.msrb.mxu1 %v1080_v1 }
  0x4e   :  { %584 = vmatpush.bf16.msrb.mxu3 %v1088_v62  ;;  %565 = vmatpush.bf16.msrb.mxu2 %v1084_v2 }
  0x4f   :  { %528 = vmatmul.bf16.vlgmr.msrb.gmra.mxu0 %v1556_v35 }
  0x50   :  { %547 = vmatmul.bf16.vlgmr.msrb.gmra.mxu1 %v1556_v35 }
  0x51   :  { %566 = vmatmul.bf16.vlgmr.msrb.gmra.mxu2 %v1556_v35  ;;  %585 = vmatmul.bf16.vlgmr.msrb.gmra.mxu3 %v1556_v35 }
  0x5f   :  { %533 = vmatmul.bf16.gmra.mxu0 %v1562_v20 }
  0x60   :  { %552 = vmatmul.bf16.gmra.mxu1 %v1562_v20 }
  0x61   :  { %571 = vmatmul.bf16.gmra.mxu2 %v1562_v20  ;;  %590 = vmatmul.bf16.gmra.mxu3 %v1562_v20 }
  0xac   :  { %v453_v3 = vpop.f32.mrf.mxu0  ;;  %v472_v5 = vpop.f32.mrf.mxu1 }
  0xad   :  { %v596_v4 = vrot.slane %v453_v3, 4  ;;  %v602_v6 = vrot.slane %v472_v5, 4 }
  0xaf   :  { %v597_v7 = vmax.f32 %v453_v3, %v596_v4  ;;  %v603_v8 = vmax.f32 %v472_v5, %v602_v6 }
  0xb1   :  { %v598_v9 = vrot.slane %v597_v7, 2  ;;  %v604_v10 = vrot.slane %v603_v8, 2 }
  0xb3   :  { %v599_v11 = vmax.f32 %v597_v7, %v598_v9  ;;  %v491_v12 = vpop.f32.mrf.mxu2  ;;  %v605_v13 = vmax.f32 %v603_v8, %v604_v10 }
  0xb4   :  { %v608_v35 = vrot.slane %v491_v12, 4  ;;  %v510_v14 = vpop.f32.mrf.mxu3  ;;  %v455_v15 = vpop.f32.mrf.mxu0 }
  0xb5   :  { %v600_v16 = vrot.slane %v599_v11, 1  ;;  %v614_v17 = vrot.slane %v510_v14, 4  ;;  %v644_v18 = vrot.slane %v455_v15, 4  ;;  %v474_v19 = vpop.f32.mrf.mxu1  ;;  %v606_v21 = vrot.slane %v605_v13, 1 }
  0xb6   :  { %v609_v20 = vmax.f32 %v491_v12, %v608_v35  ;;  %v650_v22 = vrot.slane %v474_v19, 4 }
  0xb7   :  { %v615_v23 = vmax.f32 %v510_v14, %v614_v17  ;;  %v645_v24 = vmax.f32 %v455_v15, %v644_v18  ;;  %v601_v27 = vmax.f32 %v599_v11, %v600_v16  ;;  %v607_v30 = vmax.f32 %v605_v13, %v606_v21 }
  0xb8   :  { %v610_v25 = vrot.slane %v609_v20, 2  ;;  %v651_v26 = vmax.f32 %v474_v19, %v650_v22 }
  0xb9   :  { %v616_v28 = vrot.slane %v615_v23, 2  ;;  %v646_v29 = vrot.slane %v645_v24, 2  ;;  %v788_v42 = vmax.f32 %v601_v27, 0.0  ;;  %v789_v47 = vmax.f32 %v607_v30, 0.0 }
  0xba   :  { %v611_v31 = vmax.f32 %v609_v20, %v610_v25  ;;  %v652_v32 = vrot.slane %v651_v26, 2 }
  0xbb   :  { %v617_v33 = vmax.f32 %v615_v23, %v616_v28  ;;  %v647_v34 = vmax.f32 %v645_v24, %v646_v29  ;;  %v493_v36 = vpop.f32.mrf.mxu2  ;;  %v820_v58 = vadd.f32 1.0, %v788_v42  ;;  %v821_v62 = vadd.f32 1.0, %v789_v47 }
  0xbc   :  { %v612_v37 = vrot.slane %v611_v31, 1  ;;  %v653_v38 = vmax.f32 %v651_v26, %v652_v32  ;;  %v656_v39 = vrot.slane %v493_v36, 4  ;;  %v512_v40 = vpop.f32.mrf.mxu3  ;;  %v458_v41 = vpop.f32.mrf.mxu0 }
  0xbd   :  { %v618_v43 = vrot.slane %v617_v33, 1  ;;  %v648_v44 = vrot.slane %v647_v34, 1  ;;  %v662_v45 = vrot.slane %v512_v40, 4  ;;  %v477_v46 = vpop.f32.mrf.mxu1  ;;  %v692_v53 = vrot.slane %v458_v41, 4 }
  0xbe   :  { %v613_v48 = vmax.f32 %v611_v31, %v612_v37  ;;  %v654_v49 = vrot.slane %v653_v38, 1  ;;  %v657_v50 = vmax.f32 %v493_v36, %v656_v39  ;;  %v698_v57 = vrot.slane %v477_v46, 4 }
  0xbf   :  { %v649_v51 = vmax.f32 %v647_v34, %v648_v44  ;;  %v663_v52 = vmax.f32 %v512_v40, %v662_v45  ;;  %v619_v54 = vmax.f32 %v617_v33, %v618_v43  ;;  %v693_v61 = vmax.f32 %v458_v41, %v692_v53 }
  0xc0   :  { %v655_v55 = vmax.f32 %v653_v38, %v654_v49  ;;  %v658_v56 = vrot.slane %v657_v50, 2  ;;  %v790_v59 = vmax.f32 %v613_v48, 0.0  ;;  %v699_v1 = vmax.f32 %v477_v46, %v698_v57 }
  0xc1   :  { %v664_v60 = vrot.slane %v663_v52, 2  ;;  %v796_v2 = vmax.f32 %v649_v51, 0.0  ;;  %v694_v4 = vrot.slane %v693_v61, 2  ;;  %v791_v5 = vmax.f32 %v619_v54, 0.0 }
  0xc2   :  { %v797_v63 = vmax.f32 %v655_v55, 0.0  ;;  %v659_v0 = vmax.f32 %v657_v50, %v658_v56  ;;  %1386 = vlog2.f32 %v820_v58  ;;  %v822_v9 = vadd.f32 1.0, %v790_v59 }
  0xc3   :  { %v665_v3 = vmax.f32 %v663_v52, %v664_v60  ;;  %v496_v8 = vpop.f32.mrf.mxu2  ;;  %v695_v11 = vmax.f32 %v693_v61, %v694_v4  ;;  %1388 = vlog2.f32 %v821_v62  ;;  %v700_v35 = vrot.slane %v699_v1, 2 }
  0xc4   :  { %v829_v6 = vadd.f32 1.0, %v797_v63  ;;  %v660_v7 = vrot.slane %v659_v0, 1  ;;  %v515_v12 = vpop.f32.mrf.mxu3  ;;  %v460_v14 = vpop.f32.mrf.mxu0  ;;  %v828_v15 = vadd.f32 1.0, %v796_v2  ;;  %v823_v18 = vadd.f32 1.0, %v791_v5 }
  0xc5   :  { %v666_v10 = vrot.slane %v665_v3, 1  ;;  %v696_v17 = vrot.slane %v695_v11, 1  ;;  %v701_v19 = vmax.f32 %v699_v1, %v700_v35  ;;  %v704_v21 = vrot.slane %v496_v8, 4  ;;  %v479_v37 = vpop.f32.mrf.mxu1 }
  0xc6   :  { %v661_v13 = vmax.f32 %v659_v0, %v660_v7  ;;  %1390 = vlog2.f32 %v829_v6  ;;  %v710_v20 = vrot.slane %v515_v12, 4  ;;  %v740_v24 = vrot.slane %v460_v14, 4 }
  0xc7   :  { %v667_v16 = vmax.f32 %v665_v3, %v666_v10  ;;  %1392 = vlog2.f32 %v822_v9  ;;  %v697_v23 = vmax.f32 %v695_v11, %v696_v17  ;;  %v702_v26 = vrot.slane %v701_v19, 1 }
  0xc8   :  { %v798_v25 = vmax.f32 %v661_v13, 0.0  ;;  %v705_v27 = vmax.f32 %v496_v8, %v704_v21  ;;  %v711_v28 = vmax.f32 %v515_v12, %v710_v20  ;;  %v1387_v29 = vpop.eup %1386  ;;  %1394 = vlog2.f32 %v828_v15 }
  0xc9   :  { %v799_v22 = vmax.f32 %v667_v16, 0.0  ;;  %v741_v31 = vmax.f32 %v460_v14, %v740_v24  ;;  %v1389_v32 = vpop.eup %1388  ;;  %1396 = vlog2.f32 %v823_v18  ;;  %v804_v33 = vmax.f32 %v697_v23, 0.0 }
  0xca   :  { %v703_v34 = vmax.f32 %v701_v19, %v702_v26  ;;  %v706_v36 = vrot.slane %v705_v27, 2  ;;  %v712_v39 = vrot.slane %v711_v28, 2  ;;  %v830_v41 = vadd.f32 1.0, %v798_v25 }
  0xcb   :  { %v831_v30 = vadd.f32 1.0, %v799_v22  ;;  %v498_v44 = vpop.f32.mrf.mxu2  ;;  %v855_v46 = vmul.f32 0.6931472, %v1389_v32  ;;  %v742_v48 = vrot.slane %v741_v31, 2  ;;  %v746_v49 = vrot.slane %v479_v37, 4 }
  0xcc   :  { %v1391_v38 = vpop.eup %1390  ;;  %v805_v42 = vmax.f32 %v703_v34, 0.0  ;;  %v707_v43 = vmax.f32 %v705_v27, %v706_v36  ;;  %v713_v47 = vmax.f32 %v711_v28, %v712_v39  ;;  %v517_v50 = vpop.f32.mrf.mxu3  ;;  %v853_v51 = vmul.f32 0.6931472, %v1387_v29 }
  0xcd   :  { %1398 = vlog2.f32 %v831_v30  ;;  %v871_v40 = vmul.f32 0.6931472, %v1391_v38  ;;  %v1393_v45 = vpop.eup %1392  ;;  %v836_v52 = vadd.f32 1.0, %v804_v33  ;;  %v743_v57 = vmax.f32 %v741_v31, %v742_v48  ;;  %v529_v13 = vpop.f32.mrf.mxu0 }
  0xce   :  { %v837_v53 = vadd.f32 1.0, %v805_v42  ;;  %v708_v54 = vrot.slane %v707_v43, 1  ;;  %v1395_v55 = vpop.eup %1394  ;;  %v714_v56 = vrot.slane %v713_v47, 1  ;;  %v747_v58 = vmax.f32 %v479_v37, %v746_v49  ;;  %v548_v22 = vpop.f32.mrf.mxu1 }
  0xcf   :  { %v752_v59 = vrot.slane %v498_v44, 4  ;;  %v1397_v60 = vpop.eup %1396  ;;  %v952_v61 = vrot.slane %v871_v40, 4  ;;  %1400 = vlog2.f32 %v830_v41  ;;  %v758_v63 = vrot.slane %v517_v50, 4 }
  0xd0   :  { %v709_v62 = vmax.f32 %v707_v43, %v708_v54  ;;  %v948_v1 = vrot.slane %v855_v46, 4  ;;  %1402 = vlog2.f32 %v837_v53  ;;  %v715_v2 = vmax.f32 %v713_v47, %v714_v56 }
  0xd1   :  { %v744_v3 = vrot.slane %v743_v57, 1  ;;  %v869_v4 = vmul.f32 0.6931472, %v1395_v55  ;;  %1404 = vlog2.f32 %v836_v52  ;;  %v748_v5 = vrot.slane %v747_v58, 2 }
  0xd2   :  { %v753_v6 = vmax.f32 %v498_v44, %v752_v59  ;;  %v859_v7 = vmul.f32 0.6931472, %v1397_v60  ;;  %v806_v8 = vmax.f32 %v709_v62, 0.0  ;;  %v807_v9 = vmax.f32 %v715_v2, 0.0 }
  0xd3   :  { %v1399_v0 = vpop.eup %1398  ;;  %v759_v10 = vmax.f32 %v517_v50, %v758_v63  ;;  %v1577_v11 = vsel %vm964_vm0, %v869_v4, %v952_v61  ;;  %v745_v14 = vmax.f32 %v743_v57, %v744_v3  ;;  %v749_v15 = vmax.f32 %v747_v58, %v748_v5 }
  0xd4   :  { %v875_v12 = vmul.f32 0.6931472, %v1399_v0  ;;  %v839_v35 = vadd.f32 1.0, %v807_v9  ;;  %v754_v16 = vrot.slane %v753_v6, 2  ;;  %v965_v18 = vsel %vm964_vm0, %v853_v51, %v948_v1  ;;  %v567_v32 = vpop.f32.mrf.mxu2  ;;  %v586_v58 = vpop.f32.mrf.mxu3 }
  0xd5   :  { %v1401_v17 = vpop.eup %1400  ;;  %v857_v19 = vmul.f32 0.6931472, %v1393_v45  ;;  %v760_v21 = vrot.slane %v759_v10, 2  ;;  %v620_v20 = vrot.slane %v529_v13, 4  ;;  %v949_v24 = vrot.slane %v859_v7, 4  ;;  %v531_v59 = vpop.f32.mrf.mxu0 }
  0xd6   :  { %v1403_v23 = vpop.eup %1402  ;;  %v981_v25 = vrot.slane %v1577_v11, 7  ;;  %v838_v26 = vadd.f32 1.0, %v806_v8  ;;  %1406 = vlog2.f32 %v839_v35  ;;  %v750_v28 = vrot.slane %v749_v15, 1  ;;  %v550_v5 = vpop.f32.mrf.mxu1 }
  0xd7   :  { %v1405_v27 = vpop.eup %1404  ;;  %v755_v29 = vmax.f32 %v753_v6, %v754_v16  ;;  %v761_v30 = vmax.f32 %v759_v10, %v760_v21  ;;  %v621_v31 = vmax.f32 %v529_v13, %v620_v20  ;;  %v873_v33 = vmul.f32 0.6931472, %v1401_v17 }
  0xd8   :  { %v953_v34 = vrot.slane %v875_v12, 4  ;;  %v812_v36 = vmax.f32 %v745_v14, 0.0  ;;  %v626_v37 = vrot.slane %v548_v22, 4  ;;  %v887_v38 = vmul.f32 0.6931472, %v1403_v23 }
  0xd9   :  { %v751_v39 = vmax.f32 %v749_v15, %v750_v28  ;;  %v756_v40 = vrot.slane %v755_v29, 1  ;;  %v762_v41 = vrot.slane %v761_v30, 1  ;;  %v885_v42 = vmul.f32 0.6931472, %v1405_v27 }
  0xda   :  { %v622_v43 = vrot.slane %v621_v31, 2  ;;  %v627_v44 = vmax.f32 %v548_v22, %v626_v37  ;;  %v632_v45 = vrot.slane %v567_v32, 4  ;;  %1408 = vlog2.f32 %v838_v26 }
  0xdb   :  { %v813_v46 = vmax.f32 %v751_v39, 0.0  ;;  %v757_v47 = vmax.f32 %v755_v29, %v756_v40  ;;  %v763_v48 = vmax.f32 %v761_v30, %v762_v41  ;;  %v844_v50 = vadd.f32 1.0, %v812_v36 }
  0xdc   :  { %v1407_v49 = vpop.eup %1406  ;;  %v623_v51 = vmax.f32 %v621_v31, %v622_v43  ;;  %v628_v52 = vrot.slane %v627_v44, 2  ;;  %v633_v53 = vmax.f32 %v567_v32, %v632_v45  ;;  %v956_v54 = vrot.slane %v887_v38, 4  ;;  %v569_v10 = vpop.f32.mrf.mxu2 }
  0xdd   :  { %v891_v55 = vmul.f32 0.6931472, %v1407_v49  ;;  %v845_v56 = vadd.f32 1.0, %v813_v46  ;;  %v814_v57 = vmax.f32 %v757_v47, 0.0  ;;  %v815_v60 = vmax.f32 %v763_v48, 0.0  ;;  %v588_v37 = vpop.f32.mrf.mxu3  ;;  %v534_v38 = vpop.f32.mrf.mxu0 }
  0xde   :  { %v624_v61 = vrot.slane %v623_v51, 1  ;;  %v629_v62 = vmax.f32 %v627_v44, %v628_v52  ;;  %v634_v63 = vrot.slane %v633_v53, 2  ;;  %v966_v0 = vsel %vm964_vm0, %v857_v19, %v949_v24 }
  0xdf   :  { %v983_v1 = vsel %vm982_vm1, %v981_v25, %v965_v18  ;;  %v970_v2 = vsel %vm964_vm0, %v873_v33, %v953_v34  ;;  %1410 = vlog2.f32 %v844_v50  ;;  %v847_v3 = vadd.f32 1.0, %v815_v60 }
  0xe0   :  { %v635_v4 = vmax.f32 %v633_v53, %v634_v63  ;;  %v1409_v6 = vpop.eup %1408  ;;  %1412 = vlog2.f32 %v845_v56  ;;  %v630_v7 = vrot.slane %v629_v62, 1  ;;  %v638_v8 = vrot.slane %v586_v58, 4  ;;  %v553_v56 = vpop.f32.mrf.mxu1 }
  0xe1   :  { %v668_v9 = vrot.slane %v531_v59, 4  ;;  %v1587_v12 = vsel %vm964_vm0, %v885_v42, %v956_v54  ;;  %v957_v13 = vrot.slane %v891_v55, 4  ;;  %v846_v35 = vadd.f32 1.0, %v814_v57 }
  0xe2   :  { %v625_v14 = vmax.f32 %v623_v51, %v624_v61  ;;  %v636_v15 = vrot.slane %v635_v4, 1  ;;  %v639_v16 = vmax.f32 %v586_v58, %v638_v8  ;;  %v674_v18 = vrot.slane %v550_v5, 4 }
  0xe3   :  { %v669_v17 = vmax.f32 %v531_v59, %v668_v9  ;;  %v996_v19 = vrot.slane %v970_v2, 7  ;;  %v889_v21 = vmul.f32 0.6931472, %v1409_v6  ;;  %1414 = vlog2.f32 %v847_v3 }
  0xe4   :  { %v680_v20 = vrot.slane %v569_v10, 4  ;;  %v631_v22 = vmax.f32 %v629_v62, %v630_v7  ;;  %v640_v23 = vrot.slane %v639_v16, 2  ;;  %v675_v26 = vmax.f32 %v550_v5, %v674_v18  ;;  %v572_v62 = vpop.f32.mrf.mxu2 }
  0xe5   :  { %v670_v24 = vrot.slane %v669_v17, 2  ;;  %v1411_v27 = vpop.eup %1410  ;;  %v986_v28 = vrot.slane %v1587_v12, 6  ;;  %v1591_v29 = vsel %vm964_vm0, %v889_v21, %v957_v13  ;;  %v637_v30 = vmax.f32 %v635_v4, %v636_v15  ;;  %v536_v15 = vpop.f32.mrf.mxu0 }
  0xe6   :  { %v681_v31 = vmax.f32 %v569_v10, %v680_v20  ;;  %v1413_v32 = vpop.eup %1412  ;;  %1416 = vlog2.f32 %v846_v35  ;;  %v792_v33 = vmax.f32 %v625_v14, 0.0  ;;  %v676_v36 = vrot.slane %v675_v26, 2  ;;  %v591_v14 = vpop.f32.mrf.mxu3 }
  0xe7   :  { %v671_v34 = vmax.f32 %v669_v17, %v670_v24  ;;  %v997_v39 = vsel %vm982_vm1, %v996_v19, %v966_v0  ;;  %v985_v41 = vsel %vm984_vm2, %v981_v25, %v983_v1  ;;  %v999_v42 = vrot.slane %v1591_v29, 6 }
  0xe8   :  { %v682_v40 = vrot.slane %v681_v31, 2  ;;  %v793_v43 = vmax.f32 %v631_v22, 0.0  ;;  %v641_v44 = vmax.f32 %v639_v16, %v640_v23  ;;  %v903_v46 = vmul.f32 0.6931472, %v1413_v32 }
  0xe9   :  { %v1415_v45 = vpop.eup %1414  ;;  %v794_v47 = vmax.f32 %v637_v30, 0.0  ;;  %v677_v48 = vmax.f32 %v675_v26, %v676_v36  ;;  %v686_v49 = vrot.slane %v588_v37, 4  ;;  %v998_v50 = vsel %vm984_vm2, %v996_v19, %v997_v39  ;;  %v555_v39 = vpop.f32.mrf.mxu1 }
  0xea   :  { %v1602_v51 = vsel %vm987_vm3, %v986_v28, %v985_v41  ;;  %v824_v52 = vadd.f32 1.0, %v792_v33  ;;  %v672_v11 = vrot.slane %v671_v34, 1  ;;  %v901_v53 = vmul.f32 0.6931472, %v1411_v27 }
  0xeb   :  { %v678_v25 = vrot.slane %v677_v48, 1  ;;  %v683_v54 = vmax.f32 %v681_v31, %v682_v40  ;;  %v687_v55 = vmax.f32 %v588_v37, %v686_v49  ;;  %v1607_v58 = vsel %vm987_vm3, %v999_v42, %v998_v50 }
  0xec   :  { %v1417_v57 = vpop.eup %1416  ;;  %v825_v59 = vadd.f32 1.0, %v793_v43  ;;  %v642_v60 = vrot.slane %v641_v44, 1  ;;  %v716_v61 = vrot.slane %v534_v38, 4  ;;  %v960_v63 = vrot.slane %v903_v46, 4  ;;  %v574_v46 = vpop.f32.mrf.mxu2 }
  0xed   :  { %v907_v0 = vmul.f32 0.6931472, %v1415_v45  ;;  %v826_v1 = vadd.f32 1.0, %v794_v47  ;;  %v679_v2 = vmax.f32 %v677_v48, %v678_v25  ;;  %1418 = vlog2.f32 %v824_v52 }
  0xee   :  { %v673_v3 = vmax.f32 %v671_v34, %v672_v11  ;;  %v688_v4 = vrot.slane %v687_v55, 2  ;;  %v717_v5 = vmax.f32 %v534_v38, %v716_v61  ;;  %v905_v6 = vmul.f32 0.6931472, %v1417_v57 }
  0xef   :  { %v801_v7 = vmax.f32 %v679_v2, 0.0  ;;  %v684_v8 = vrot.slane %v683_v54, 1  ;;  %v722_v9 = vrot.slane %v553_v56, 4  ;;  %1420 = vlog2.f32 %v825_v59 }
  0xf0   :  { %v643_v10 = vmax.f32 %v641_v44, %v642_v60  ;;  %v689_v13 = vmax.f32 %v687_v55, %v688_v4  ;;  %v718_v35 = vrot.slane %v717_v5, 2  ;;  %v1610_v16 = vsel %vm964_vm0, %v901_v53, %v960_v63  ;;  %v593_v4 = vpop.f32.mrf.mxu3 }
  0xf1   :  { %v961_v17 = vrot.slane %v907_v0, 4  ;;  %1422 = vlog2.f32 %v826_v1  ;;  %v833_v18 = vadd.f32 1.0, %v801_v7  ;;  %v800_v19 = vmax.f32 %v673_v3, 0.0 }
  0xf2   :  { %v690_v21 = vrot.slane %v689_v13, 1  ;;  %v719_v20 = vmax.f32 %v717_v5, %v718_v35  ;;  %v723_v22 = vmax.f32 %v553_v56, %v722_v9  ;;  %v685_v23 = vmax.f32 %v683_v54, %v684_v8 }
  0xf3   :  { %v728_v24 = vrot.slane %v572_v62, 4  ;;  %v734_v26 = vrot.slane %v591_v14, 4  ;;  %v764_v27 = vrot.slane %v536_v15, 4  ;;  %v1419_v30 = vpop.eup %1418  ;;  %v795_v31 = vmax.f32 %v643_v10, 0.0 }
  0xf4   :  { %v691_v32 = vmax.f32 %v689_v13, %v690_v21  ;;  %v720_v33 = vrot.slane %v719_v20, 1  ;;  %v724_v34 = vrot.slane %v723_v22, 2  ;;  %1424 = vlog2.f32 %v833_v18 }
  0xf5   :  { %v729_v36 = vmax.f32 %v572_v62, %v728_v24  ;;  %v735_v37 = vmax.f32 %v591_v14, %v734_v26  ;;  %v765_v38 = vmax.f32 %v536_v15, %v764_v27  ;;  %v1421_v40 = vpop.eup %1420  ;;  %v832_v41 = vadd.f32 1.0, %v800_v19 }
  0xf6   :  { %v803_v43 = vmax.f32 %v691_v32, 0.0  ;;  %v721_v44 = vmax.f32 %v719_v20, %v720_v33  ;;  %v725_v45 = vmax.f32 %v723_v22, %v724_v34  ;;  %v802_v48 = vmax.f32 %v685_v23, 0.0 }
  0xf7   :  { %v1612_v47 = vpop.eup %1422  ;;  %v730_v49 = vrot.slane %v729_v36, 2  ;;  %v736_v50 = vrot.slane %v735_v37, 2  ;;  %v766_v52 = vrot.slane %v765_v38, 2  ;;  %v770_v54 = vrot.slane %v555_v39, 4 }
  0xf8   :  { %v835_v11 = vadd.f32 1.0, %v803_v43  ;;  %v808_v53 = vmax.f32 %v721_v44, 0.0  ;;  %v726_v25 = vrot.slane %v725_v45, 1  ;;  %v776_v59 = vrot.slane %v574_v46, 4 }
  0xf9   :  { %v731_v55 = vmax.f32 %v729_v36, %v730_v49  ;;  %v737_v56 = vmax.f32 %v735_v37, %v736_v50  ;;  %v767_v57 = vmax.f32 %v765_v38, %v766_v52  ;;  %v991_v60 = vrot.slane %v1610_v16, 5 }
  0xfa   :  { %v1616_v61 = vsel %vm964_vm0, %v905_v6, %v961_v17  ;;  %1426 = vlog2.f32 %v832_v41  ;;  %v727_v62 = vmax.f32 %v725_v45, %v726_v25  ;;  %v1425_v63 = vpop.eup %1424  ;;  %v827_v0 = vadd.f32 1.0, %v795_v31 }
  0xfb   :  { %v840_v1 = vadd.f32 1.0, %v808_v53  ;;  %v732_v2 = vrot.slane %v731_v55, 1  ;;  %v738_v3 = vrot.slane %v737_v56, 1  ;;  %v834_v5 = vadd.f32 1.0, %v802_v48 }
  0xfc   :  { %1428 = vlog2.f32 %v835_v11  ;;  %v809_v7 = vmax.f32 %v727_v62, 0.0  ;;  %v768_v8 = vrot.slane %v767_v57, 1  ;;  %v771_v13 = vmax.f32 %v555_v39, %v770_v54 }
  0xfd   :  { %v733_v9 = vmax.f32 %v731_v55, %v732_v2  ;;  %v739_v10 = vmax.f32 %v737_v56, %v738_v3  ;;  %v777_v35 = vmax.f32 %v574_v46, %v776_v59  ;;  %v879_v14 = vmul.f32 0.6931472, %v1425_v63 }
  0xfe   :  { %v841_v15 = vadd.f32 1.0, %v809_v7  ;;  %v769_v6 = vmax.f32 %v767_v57, %v768_v8  ;;  %v782_v17 = vrot.slane %v593_v4, 4  ;;  %1430 = vlog2.f32 %v840_v1 }
  0xff   :  { %v810_v18 = vmax.f32 %v733_v9, 0.0  ;;  %v811_v19 = vmax.f32 %v739_v10, 0.0  ;;  %v772_v21 = vrot.slane %v771_v13, 2  ;;  %v1618_v22 = vmul.f32 0.6931472, %v1419_v30 }
 0x100   :  { %v1427_v20 = vpop.eup %1426  ;;  %1432 = vlog2.f32 %v841_v15  ;;  %v778_v23 = vrot.slane %v777_v35, 2  ;;  %v783_v24 = vmax.f32 %v593_v4, %v782_v17  ;;  %v1002_v26 = vrot.slane %v1616_v61, 5 }
 0x101   :  { %v842_v27 = vadd.f32 1.0, %v810_v18  ;;  %v843_v31 = vadd.f32 1.0, %v811_v19  ;;  %v816_v32 = vmax.f32 %v769_v6, 0.0  ;;  %v863_v34 = vmul.f32 0.6931472, %v1421_v40 }
 0x102   :  { %v1429_v33 = vpop.eup %1428  ;;  %1434 = vlog2.f32 %v827_v0  ;;  %v773_v36 = vmax.f32 %v771_v13, %v772_v21  ;;  %v779_v37 = vmax.f32 %v777_v35, %v778_v23  ;;  %v877_v38 = vmul.f32 0.6931472, %v1427_v20 }
 0x103   :  { %v954_v39 = vrot.slane %v879_v14, 4  ;;  %1436 = vlog2.f32 %v834_v5  ;;  %v784_v41 = vrot.slane %v783_v24, 2  ;;  %v883_v45 = vmul.f32 0.6931472, %v1429_v33 }
 0x104   :  { %1438 = vlog2.f32 %v843_v31  ;;  %v774_v30 = vrot.slane %v773_v36, 1  ;;  %v780_v43 = vrot.slane %v779_v37, 1  ;;  %v1431_v44 = vpop.eup %1430  ;;  %v848_v46 = vadd.f32 1.0, %v816_v32 }
 0x105   :  { %1440 = vlog2.f32 %v842_v27  ;;  %v785_v48 = vmax.f32 %v783_v24, %v784_v41  ;;  %v990_v40 = vsel %vm989_vm4, %v986_v28, %v1602_v51  ;;  %v971_v55 = vsel %vm964_vm0, %v877_v38, %v954_v39 }
 0x106   :  { %v1433_v49 = vpop.eup %1432  ;;  %v775_v50 = vmax.f32 %v773_v36, %v774_v30  ;;  %v781_v52 = vmax.f32 %v779_v37, %v780_v43  ;;  %v993_v25 = vsel %vm992_vm5, %v991_v60, %v990_v40  ;;  %v955_v61 = vrot.slane %v883_v45, 4 }
 0x107   :  { %v895_v11 = vmul.f32 0.6931472, %v1433_v49  ;;  %v786_v53 = vrot.slane %v785_v48, 1  ;;  %v995_v59 = vsel %vm994_vm6, %v991_v60, %v993_v25  ;;  %v893_v28 = vmul.f32 0.6931472, %v1431_v44 }
 0x108   :  { %v1435_v54 = vpop.eup %1434  ;;  %v817_v56 = vmax.f32 %v775_v50, 0.0  ;;  %v818_v57 = vmax.f32 %v781_v52, 0.0  ;;  %v1001_v62 = vsel %vm989_vm4, %v999_v42, %v1607_v58  ;;  %1027 = vst [vmem:[#allocation7] sm:$0xff] %v995_v59  ;;  %1442 = vlog2.f32 %v848_v46 }
 0x109   :  { %v1437_v12 = vpop.eup %1436  ;;  %v787_v51 = vmax.f32 %v785_v48, %v786_v53  ;;  %v1003_v2 = vsel %vm992_vm5, %v1002_v26, %v1001_v62  ;;  %v958_v16 = vrot.slane %v895_v11, 4  ;;  %v950_v7 = vrot.slane %v863_v34, 4 }
 0x10a   :  { %v1439_v63 = vpop.eup %1438  ;;  %v849_v0 = vadd.f32 1.0, %v817_v56  ;;  %v850_v1 = vadd.f32 1.0, %v818_v57  ;;  %v1004_v5 = vsel %vm994_vm6, %v1002_v26, %v1003_v2  ;;  %v867_v8 = vmul.f32 0.6931472, %v1435_v54 }
 0x10b   :  { %v1441_v3 = vpop.eup %1440  ;;  %v899_v4 = vmul.f32 0.6931472, %v1439_v63  ;;  %v819_v60 = vmax.f32 %v787_v51, 0.0  ;;  %v881_v9 = vmul.f32 0.6931472, %v1437_v12  ;;  %1028 = vst [vmem:[#allocation7 + $0x8] sm:$0xff] %v1004_v5  ;;  %v975_v13 = vsel %vm964_vm0, %v893_v28, %v958_v16 }
 0x10c   :  { %1444 = vlog2.f32 %v849_v0  ;;  %v1005_v29 = vrot.slane %v971_v55, 7  ;;  %v967_v14 = vsel %vm964_vm0, %v1618_v22, %v950_v7  ;;  %v951_v15 = vrot.slane %v867_v8, 4 }
 0x10d   :  { %v851_v42 = vadd.f32 1.0, %v819_v60  ;;  %v972_v58 = vsel %vm964_vm0, %v881_v9, %v955_v61  ;;  %v959_v10 = vrot.slane %v899_v4, 4  ;;  %1446 = vlog2.f32 %v850_v1 }
 0x10e   :  { %v1443_v35 = vpop.eup %1442  ;;  %v897_v6 = vmul.f32 0.6931472, %v1441_v3  ;;  %v1006_v17 = vsel %vm982_vm1, %v1005_v29, %v967_v14  ;;  %v1014_v18 = vrot.slane %v972_v58, 7  ;;  %v865_v21 = vmul.f32 0.6931472, %v1612_v47 }
 0x10f   :  { %1448 = vlog2.f32 %v851_v42  ;;  %v1008_v20 = vrot.slane %v975_v13, 6  ;;  %v1007_v31 = vsel %vm984_vm2, %v1005_v29, %v1006_v17  ;;  %v909_v34 = vmul.f32 0.6931472, %v1443_v35 }
 0x110   :  { %v976_v23 = vsel %vm964_vm0, %v897_v6, %v959_v10  ;;  %v968_v27 = vsel %vm964_vm0, %v865_v21, %v951_v15 }
 0x111   :  { %v1015_v22 = vsel %vm982_vm1, %v1014_v18, %v968_v27  ;;  %v1017_v33 = vrot.slane %v976_v23, 6  ;;  %v1009_v37 = vsel %vm987_vm3, %v1008_v20, %v1007_v31 }
 0x112   :  { %v1445_v19 = vpop.eup %1444  ;;  %v1016_v39 = vsel %vm984_vm2, %v1014_v18, %v1015_v22  ;;  %v1010_v45 = vsel %vm989_vm4, %v1008_v20, %v1009_v37 }
 0x113   :  { %v911_v24 = vmul.f32 0.6931472, %v1445_v19  ;;  %v1447_v26 = vpop.eup %1446  ;;  %v1018_v44 = vsel %vm987_vm3, %v1017_v33, %v1016_v39 }
 0x114   :  { %v913_v30 = vmul.f32 0.6931472, %v1447_v26  ;;  %v1019_v52 = vsel %vm989_vm4, %v1017_v33, %v1018_v44 }
 0x115   :  { %v1449_v32 = vpop.eup %1448  ;;  %v962_v36 = vrot.slane %v911_v24, 4 }
 0x116   :  { %v915_v38 = vmul.f32 0.6931472, %v1449_v32 }
 0x117   :  { %v979_v47 = vsel %vm964_vm0, %v909_v34, %v962_v36 }
 0x118   :  { %v1011_v41 = vrot.slane %v979_v47, 5  ;;  %v963_v43 = vrot.slane %v915_v38, 4 }
 0x11a   :  { %v980_v46 = vsel %vm964_vm0, %v913_v30, %v963_v43  ;;  %v1012_v48 = vsel %vm992_vm5, %v1011_v41, %v1010_v45 }
 0x11b   :  { %v1020_v49 = vrot.slane %v980_v46, 5  ;;  %v1013_v50 = vsel %vm994_vm6, %v1011_v41, %v1012_v48 }
 0x11c   :  { %1029 = vst [vmem:[#allocation7 + $0x10] sm:$0xff] %v1013_v50 }
 0x11d   :  { %v1021_v40 = vsel %vm992_vm5, %v1020_v49, %v1019_v52 }
 0x11e   :  { %v1022_v11 = vsel %vm994_vm6, %v1020_v49, %v1021_v40 }
 0x11f   :  { %1030 = vst [vmem:[#allocation7 + $0x18] sm:$0xff] %v1022_v11 }
 0x120   :  { %1041 = dma.vmem_to_hbm [thread:$0]  %s1037_s1, 512, %s1039_s25, [#allocation4]  }
 0x121   :  { %1526 = dma.done.wait [#allocation4], 512  }
 0x122   :  { %1527 = vsyncadd [#allocation4], 4294966784 }
 0x123   :  { %1046 = vsyncpa [#allocation3], 1 }
 0x124   :  { %1047 = vsyncpa [#allocation6], 1 }
 0x125   :  { %1048 = vsyncpa [#allocation4], 1 }

</bundles_post_ra>
